<compile_context>
chip_gen: v7x
topology: tpu7x:2x2x1
jax: 0.10.0
libtpu: 0.0.40
codegen_flags: <defaults>
</compile_context>

<pallas_src>
import functools

import jax
import jax.numpy as jnp
from jax.experimental import pallas as pl
from jax.experimental.pallas import tpu as pltpu


def _round_up(x, m):
    return (x + m - 1) // m * m


# ----------------------------------------------------------------------------
# Fused feature-major kernel:
#   enc 1x1 conv -> VQ (proxy-distance / argmin / one-hot quantize) -> dec 1x1
#   conv, plus lane-dense per-tile partial SSE for the VQ loss.
# Shapes inside the kernel (TN = token tile on the lane axis):
#   x:(C,TN)  z:(D,TN)  cross:(K,TN)  idx:(1,TN)  quant:(D,TN)  x_r:(C,TN)
# ----------------------------------------------------------------------------
def _vqvae_fused_kernel(
    x_ref, ewt_ref, eb_ref, emb_ref, embt_ref, hesq_ref, dwt_ref, db_ref,  # in
    z_ref, xr_ref, idx_ref, sse_ref,                                       # out
    *, hw, masked, num_emb,
):
    j = pl.program_id(1)

    x = x_ref[0]                                                   # (C, TN) bf16

    # --- encoder (1x1 conv == pointwise linear), bf16 MXU, f32 accumulate ---
    z = jnp.dot(ewt_ref[...], x, preferred_element_type=jnp.float32) + eb_ref[...]
    z_ref[0] = z                                                   # (D, TN) f32

    # --- proxy distances to codebook (argmin-equivalent) ---
    z_b = z.astype(jnp.bfloat16)
    cross = jnp.dot(emb_ref[...], z_b, preferred_element_type=jnp.float32)  # (K, TN)
    dist = hesq_ref[...] - cross           # 0.5*||e||^2 - z.e  (per-token const dropped)

    # --- first-occurrence argmin over the codebook (sublane) axis ---
    iota_k = jax.lax.broadcasted_iota(jnp.int32, dist.shape, 0)    # (K, TN)
    dmin = jnp.min(dist, axis=0, keepdims=True)                    # (1, TN)
    idx = jnp.min(jnp.where(dist <= dmin, iota_k, num_emb),
                  axis=0, keepdims=True)                           # (1, TN) int32
    idx_ref[0] = idx                                               # lane-dense store

    # --- one-hot quantize (quantized tensor never leaves VMEM) ---
    enc = (iota_k == idx).astype(jnp.bfloat16)                     # (K, TN)
    quant = jnp.dot(embt_ref[...], enc, preferred_element_type=jnp.float32)  # (D, TN)

    # --- decoder (1x1 conv), fused ---
    xr_ref[0] = (
        jnp.dot(dwt_ref[...], quant.astype(jnp.bfloat16),
                preferred_element_type=jnp.float32)
        + db_ref[...]
    )                                                              # (C, TN) f32

    # --- lane-dense partial SSE for the VQ loss (pure VPU adds) ---
    diff = quant - z
    diff2 = diff * diff                                            # (D, TN) f32
    d, tn = diff2.shape
    if masked:
        lane = jax.lax.broadcasted_iota(jnp.int32, (1, tn), 1)
        m = ((j * tn + lane) < hw).astype(jnp.float32)             # (1, TN)
        diff2 = diff2 * m
    # (D, TN) -> (D/8, 8, TN): layout-preserving split, add across vreg groups.
    sse_ref[0] = jnp.sum(diff2.reshape(d // 8, 8, tn), axis=0)     # (8, TN)


# ----------------------------------------------------------------------------
# Full VQVAE forward: returns (vq_loss, x_r, asd, ind) like the PyTorch module.
# ----------------------------------------------------------------------------
def vqvae_forward(params, x, ccost=0.25, tn_max=1024):
    b, c, h, w = x.shape
    emb = params["emb"].astype(jnp.float32)
    k_num, d = emb.shape
    hw = h * w
    n = b * hw
    # TODO(synk): emb_dim not a multiple of 8 would need padded stats groups.
    assert d % 8 == 0, "embedding_dim must be a multiple of 8"

    # Token tile (lane axis): multiple of 128, capped so the grid keeps a few
    # steps for pipelining / v7x megacore even at small shapes.
    tn = min(tn_max, _round_up(hw, 128))
    steps_wanted = 8
    per_b = max(1, steps_wanted // max(b, 1))
    tn = max(128, min(tn, _round_up(pl.cdiv(hw, per_b), 128)))
    n_hw = pl.cdiv(hw, tn)
    hw_pad = n_hw * tn
    masked = hw_pad != hw

    # x stays in its native NCHW layout; just flatten the spatial dims.
    x_in = x.reshape(b, c, hw).astype(jnp.bfloat16)
    if masked:
        x_in = jnp.pad(x_in, ((0, 0), (0, 0), (0, hw_pad - hw)))

    # Hoisted / pre-transposed (tiny) parameters.
    emb_b = emb.astype(jnp.bfloat16)                         # (K, D)
    emb_t = emb.T.astype(jnp.bfloat16)                       # (D, K)
    half_esq = 0.5 * jnp.sum(emb * emb, axis=1, keepdims=True)  # (K, 1) f32
    ewt = params["enc_w"].T.astype(jnp.bfloat16)              # (D, C)
    dwt = params["dec_w"].T.astype(jnp.bfloat16)              # (C, D)
    eb = params["enc_b"].astype(jnp.float32).reshape(d, 1)    # (D, 1)
    db = params["dec_b"].astype(jnp.float32).reshape(c, 1)    # (C, 1)

    kern = functools.partial(_vqvae_fused_kernel, hw=hw, masked=masked,
                             num_emb=k_num)

    z_out, xr_out, idx_out, sse_part = pl.pallas_call(
        kern,
        out_shape=(
            jax.ShapeDtypeStruct((b, d, hw_pad), jnp.float32),    # z (asd), NCHW-flat
            jax.ShapeDtypeStruct((b, c, hw_pad), jnp.float32),    # x_r, NCHW-flat
            jax.ShapeDtypeStruct((b, 1, hw_pad), jnp.int32),      # indices
            jax.ShapeDtypeStruct((b, n_hw * 8, tn), jnp.float32), # SSE partials
        ),
        grid_spec=pltpu.PrefetchScalarGridSpec(
            num_scalar_prefetch=0,
            grid=(b, n_hw),
            in_specs=[
                pl.BlockSpec((1, c, tn), lambda bi, j: (bi, 0, j)),   # x tokens
                pl.BlockSpec((d, c), lambda bi, j: (0, 0)),           # enc_w^T (resident)
                pl.BlockSpec((d, 1), lambda bi, j: (0, 0)),           # enc_b
                pl.BlockSpec((k_num, d), lambda bi, j: (0, 0)),       # codebook (K, D)
                pl.BlockSpec((d, k_num), lambda bi, j: (0, 0)),       # codebook^T (D, K)
                pl.BlockSpec((k_num, 1), lambda bi, j: (0, 0)),       # 0.5*||e||^2
                pl.BlockSpec((c, d), lambda bi, j: (0, 0)),           # dec_w^T
                pl.BlockSpec((c, 1), lambda bi, j: (0, 0)),           # dec_b
            ],
            out_specs=[
                pl.BlockSpec((1, d, tn), lambda bi, j: (bi, 0, j)),
                pl.BlockSpec((1, c, tn), lambda bi, j: (bi, 0, j)),
                pl.BlockSpec((1, 1, tn), lambda bi, j: (bi, 0, j)),
                pl.BlockSpec((1, 8, tn), lambda bi, j: (bi, j, 0)),
            ],
        ),
        compiler_params=pltpu.CompilerParams(
            dimension_semantics=("parallel", "parallel"),   # no cross-step state
            vmem_limit_bytes=32 * 1024 * 1024,
        ),
    )(x_in, ewt, eb, emb_b, emb_t, half_esq, dwt, db)

    # Tiny scalar epilogue: q_latent_loss + ccost * e_latent_loss
    #   == (1 + ccost) * MSE(quant, z)   (forward value).
    vq_loss = (1.0 + ccost) * jnp.sum(sse_part) / float(n * d)

    # Outputs are already feature-major == NCHW; just drop padding and reshape.
    asd = z_out[:, :, :hw].reshape(b, d, h, w)     # (B, D, H, W)
    x_r = xr_out[:, :, :hw].reshape(b, c, h, w)    # (B, C, H, W)
    ind = idx_out[:, :, :hw].reshape(b, 1, h, w)   # (B, 1, H, W)
    return vq_loss, x_r, asd, ind


def init_params(key, c_in, emb_num, emb_dim):
    k1, k2, k3, k4, k5 = jax.random.split(key, 5)
    emb = jax.random.uniform(
        k1, (emb_num, emb_dim), jnp.float32,
        minval=-1.0 / emb_num, maxval=1.0 / emb_num,
    )
    enc_w = jax.random.normal(k2, (c_in, emb_dim), jnp.float32) * 0.1
    enc_b = jax.random.normal(k3, (emb_dim,), jnp.float32) * 0.01
    dec_w = jax.random.normal(k4, (emb_dim, c_in), jnp.float32) * 0.1
    dec_b = jax.random.normal(k5, (c_in,), jnp.float32) * 0.01
    return dict(emb=emb, enc_w=enc_w, enc_b=enc_b, dec_w=dec_w, dec_b=dec_b)


if __name__ == "__main__":
    key = jax.random.PRNGKey(0)
    kx, kp = jax.random.split(key)

    B, C, H, W = 2, 4, 16, 16
    EMB_NUM, EMB_DIM = 64, 32

    x = jax.random.normal(kx, (B, C, H, W), jnp.float32)
    params = init_params(kp, C, EMB_NUM, EMB_DIM)

    fwd = jax.jit(functools.partial(vqvae_forward, ccost=0.25))
    vq_loss, x_r, asd, ind = fwd(params, x)
    jax.block_until_ready((vq_loss, x_r, asd, ind))

    assert x_r.shape == (B, C, H, W)
    assert asd.shape == (B, EMB_DIM, H, W)
    assert ind.shape == (B, 1, H, W)
    assert bool(jnp.isfinite(vq_loss))
    assert bool(jnp.all(jnp.isfinite(x_r)))
    assert bool(jnp.all((ind >= 0) & (ind < EMB_NUM)))
    print("KERNEL_OK")
</pallas_src>

<mosaic_0001>
module attributes {stable_mosaic.version = 11 : i64} {
  func.func @_vqvae_fused_kernel(%arg0: i32, %arg1: i32, %arg2: memref<1x4x128xbf16, #tpu.memory_space<vmem>>, %arg3: memref<32x4xbf16, #tpu.memory_space<vmem>>, %arg4: memref<32x1xf32, #tpu.memory_space<vmem>>, %arg5: memref<64x32xbf16, #tpu.memory_space<vmem>>, %arg6: memref<32x64xbf16, #tpu.memory_space<vmem>>, %arg7: memref<64x1xf32, #tpu.memory_space<vmem>>, %arg8: memref<4x32xbf16, #tpu.memory_space<vmem>>, %arg9: memref<4x1xf32, #tpu.memory_space<vmem>>, %arg10: memref<1x32x128xf32, #tpu.memory_space<vmem>>, %arg11: memref<1x4x128xf32, #tpu.memory_space<vmem>>, %arg12: memref<1x1x128xi32, #tpu.memory_space<vmem>>, %arg13: memref<1x8x128xf32, #tpu.memory_space<vmem>>) attributes {dimension_semantics = [#tpu.dimension_semantics<parallel>, #tpu.dimension_semantics<parallel>], iteration_bounds = array<i64: 2, 2>, scalar_prefetch = 0 : i64, scratch_operands = 0 : i64, tpu.core_type = #tpu.core_type<tc>, window_params = [{transform_indices = @transform_0, window_bounds = array<i64: 1, 4, 128>}, {pipeline_mode = #tpu.pipeline_mode<synchronous>, transform_indices = @transform_1, window_bounds = array<i64: 32, 4>}, {pipeline_mode = #tpu.pipeline_mode<synchronous>, transform_indices = @transform_2, window_bounds = array<i64: 32, 1>}, {pipeline_mode = #tpu.pipeline_mode<synchronous>, transform_indices = @transform_3, window_bounds = array<i64: 64, 32>}, {pipeline_mode = #tpu.pipeline_mode<synchronous>, transform_indices = @transform_4, window_bounds = array<i64: 32, 64>}, {pipeline_mode = #tpu.pipeline_mode<synchronous>, transform_indices = @transform_5, window_bounds = array<i64: 64, 1>}, {pipeline_mode = #tpu.pipeline_mode<synchronous>, transform_indices = @transform_6, window_bounds = array<i64: 4, 32>}, {pipeline_mode = #tpu.pipeline_mode<synchronous>, transform_indices = @transform_7, window_bounds = array<i64: 4, 1>}, {transform_indices = @transform_8, window_bounds = array<i64: 1, 32, 128>}, {transform_indices = @transform_9, window_bounds = array<i64: 1, 4, 128>}, {transform_indices = @transform_10, window_bounds = array<i64: 1, 1, 128>}, {transform_indices = @transform_11, window_bounds = array<i64: 1, 8, 128>}]} {
    %c0 = arith.constant 0 : index
    %c0_0 = arith.constant 0 : index
    %c0_1 = arith.constant 0 : index
    %0 = vector.load %arg2[%c0, %c0_0, %c0_1] : memref<1x4x128xbf16, #tpu.memory_space<vmem>>, vector<1x4x128xbf16>
    %1 = vector.shape_cast %0 : vector<1x4x128xbf16> to vector<4x128xbf16>
    %c0_2 = arith.constant 0 : index
    %c0_3 = arith.constant 0 : index
    %2 = vector.load %arg3[%c0_2, %c0_3] : memref<32x4xbf16, #tpu.memory_space<vmem>>, vector<32x4xbf16>
    %cst = arith.constant dense<0.000000e+00> : vector<32x128xf32>
    %3 = tpu.matmul %2, %1, %cst {dimension_numbers = #tpu.dot_dimension_numbers<[1], [0], [0], [1], [0, 0, 1, 1], [], []>} : vector<32x4xbf16>, vector<4x128xbf16>, vector<32x128xf32> -> vector<32x128xf32>
    %c0_4 = arith.constant 0 : index
    %c0_5 = arith.constant 0 : index
    %4 = vector.load %arg4[%c0_4, %c0_5] : memref<32x1xf32, #tpu.memory_space<vmem>>, vector<32x1xf32>
    %5 = vector.broadcast %4 : vector<32x1xf32> to vector<32x128xf32>
    %6 = arith.addf %3, %5 : vector<32x128xf32>
    %c0_6 = arith.constant 0 : index
    %c0_7 = arith.constant 0 : index
    %c0_8 = arith.constant 0 : index
    %7 = vector.load %arg10[%c0_6, %c0_7, %c0_8] : memref<1x32x128xf32, #tpu.memory_space<vmem>>, vector<1x32x128xf32>
    %8 = vector.shape_cast %7 : vector<1x32x128xf32> to vector<32x128xf32>
    %9 = vector.shape_cast %6 : vector<32x128xf32> to vector<1x32x128xf32>
    tpu.vector_store %arg10[%c0_6, %c0_7, %c0_8], %9 {strides = array<i32>} : memref<1x32x128xf32, #tpu.memory_space<vmem>>, vector<1x32x128xf32>,
    %10 = arith.truncf %6 : vector<32x128xf32> to vector<32x128xbf16>
    %c0_9 = arith.constant 0 : index
    %c0_10 = arith.constant 0 : index
    %11 = vector.load %arg5[%c0_9, %c0_10] : memref<64x32xbf16, #tpu.memory_space<vmem>>, vector<64x32xbf16>
    %cst_11 = arith.constant dense<0.000000e+00> : vector<64x128xf32>
    %12 = tpu.matmul %11, %10, %cst_11 {dimension_numbers = #tpu.dot_dimension_numbers<[1], [0], [0], [1], [0, 0, 1, 1], [], []>} : vector<64x32xbf16>, vector<32x128xbf16>, vector<64x128xf32> -> vector<64x128xf32>
    %c0_12 = arith.constant 0 : index
    %c0_13 = arith.constant 0 : index
    %13 = vector.load %arg7[%c0_12, %c0_13] : memref<64x1xf32, #tpu.memory_space<vmem>>, vector<64x1xf32>
    %14 = vector.broadcast %13 : vector<64x1xf32> to vector<64x128xf32>
    %15 = arith.subf %14, %12 : vector<64x128xf32>
    %16 = tpu.iota {dimensions = array<i32: 0>} : vector<64x128xi32>
    %cst_14 = arith.constant dense<0x7F800000> : vector<128xf32>
    %17 = vector.multi_reduction <minimumf>, %15, %cst_14 [0] : vector<64x128xf32> to vector<128xf32>
    %18 = vector.shape_cast %17 : vector<128xf32> to vector<1x128xf32>
    %19 = vector.broadcast %18 : vector<1x128xf32> to vector<64x128xf32>
    %20 = arith.cmpf ole, %15, %19 : vector<64x128xf32>
    %c64_i32 = arith.constant 64 : i32
    %21 = vector.broadcast %c64_i32 : i32 to vector<64x128xi32>
    %22 = arith.select %20, %16, %21 : vector<64x128xi1>, vector<64x128xi32>
    %cst_15 = arith.constant dense<2147483647> : vector<128xi32>
    %23 = vector.multi_reduction <minsi>, %22, %cst_15 [0] : vector<64x128xi32> to vector<128xi32>
    %24 = vector.shape_cast %23 : vector<128xi32> to vector<1x128xi32>
    %c0_16 = arith.constant 0 : index
    %c0_17 = arith.constant 0 : index
    %c0_18 = arith.constant 0 : index
    %25 = vector.load %arg12[%c0_16, %c0_17, %c0_18] : memref<1x1x128xi32, #tpu.memory_space<vmem>>, vector<1x1x128xi32>
    %26 = vector.shape_cast %25 : vector<1x1x128xi32> to vector<1x128xi32>
    %27 = vector.shape_cast %24 : vector<1x128xi32> to vector<1x1x128xi32>
    tpu.vector_store %arg12[%c0_16, %c0_17, %c0_18], %27 {strides = array<i32>} : memref<1x1x128xi32, #tpu.memory_space<vmem>>, vector<1x1x128xi32>,
    %28 = vector.broadcast %24 : vector<1x128xi32> to vector<64x128xi32>
    %29 = arith.cmpi eq, %16, %28 : vector<64x128xi32>
    %30 = arith.extui %29 : vector<64x128xi1> to vector<64x128xi32>
    %31 = arith.sitofp %30 : vector<64x128xi32> to vector<64x128xf32>
    %32 = arith.truncf %31 : vector<64x128xf32> to vector<64x128xbf16>
    %c0_19 = arith.constant 0 : index
    %c0_20 = arith.constant 0 : index
    %33 = vector.load %arg6[%c0_19, %c0_20] : memref<32x64xbf16, #tpu.memory_space<vmem>>, vector<32x64xbf16>
    %cst_21 = arith.constant dense<0.000000e+00> : vector<32x128xf32>
    %34 = tpu.matmul %33, %32, %cst_21 {dimension_numbers = #tpu.dot_dimension_numbers<[1], [0], [0], [1], [0, 0, 1, 1], [], []>} : vector<32x64xbf16>, vector<64x128xbf16>, vector<32x128xf32> -> vector<32x128xf32>
    %c0_22 = arith.constant 0 : index
    %c0_23 = arith.constant 0 : index
    %35 = vector.load %arg8[%c0_22, %c0_23] : memref<4x32xbf16, #tpu.memory_space<vmem>>, vector<4x32xbf16>
    %36 = arith.truncf %34 : vector<32x128xf32> to vector<32x128xbf16>
    %cst_24 = arith.constant dense<0.000000e+00> : vector<4x128xf32>
    %37 = tpu.matmul %35, %36, %cst_24 {dimension_numbers = #tpu.dot_dimension_numbers<[1], [0], [0], [1], [0, 0, 1, 1], [], []>} : vector<4x32xbf16>, vector<32x128xbf16>, vector<4x128xf32> -> vector<4x128xf32>
    %c0_25 = arith.constant 0 : index
    %c0_26 = arith.constant 0 : index
    %38 = vector.load %arg9[%c0_25, %c0_26] : memref<4x1xf32, #tpu.memory_space<vmem>>, vector<4x1xf32>
    %39 = vector.broadcast %38 : vector<4x1xf32> to vector<4x128xf32>
    %40 = arith.addf %37, %39 : vector<4x128xf32>
    %c0_27 = arith.constant 0 : index
    %c0_28 = arith.constant 0 : index
    %c0_29 = arith.constant 0 : index
    %41 = vector.load %arg11[%c0_27, %c0_28, %c0_29] : memref<1x4x128xf32, #tpu.memory_space<vmem>>, vector<1x4x128xf32>
    %42 = vector.shape_cast %41 : vector<1x4x128xf32> to vector<4x128xf32>
    %43 = vector.shape_cast %40 : vector<4x128xf32> to vector<1x4x128xf32>
    tpu.vector_store %arg11[%c0_27, %c0_28, %c0_29], %43 {strides = array<i32>} : memref<1x4x128xf32, #tpu.memory_space<vmem>>, vector<1x4x128xf32>,
    %44 = arith.subf %34, %6 : vector<32x128xf32>
    %45 = arith.mulf %44, %44 : vector<32x128xf32>
    %46 = vector.shape_cast %45 : vector<32x128xf32> to vector<4x8x128xf32>
    %cst_30 = arith.constant dense<0.000000e+00> : vector<8x128xf32>
    %47 = vector.multi_reduction <add>, %46, %cst_30 [0] : vector<4x8x128xf32> to vector<8x128xf32>
    %c0_31 = arith.constant 0 : index
    %c0_32 = arith.constant 0 : index
    %c0_33 = arith.constant 0 : index
    %48 = vector.load %arg13[%c0_31, %c0_32, %c0_33] : memref<1x8x128xf32, #tpu.memory_space<vmem>>, vector<1x8x128xf32>
    %49 = vector.shape_cast %48 : vector<1x8x128xf32> to vector<8x128xf32>
    %50 = vector.shape_cast %47 : vector<8x128xf32> to vector<1x8x128xf32>
    tpu.vector_store %arg13[%c0_31, %c0_32, %c0_33], %50 {strides = array<i32>} : memref<1x8x128xf32, #tpu.memory_space<vmem>>, vector<1x8x128xf32>,
    return
  }
  func.func @transform_0(%arg0: i32, %arg1: i32) -> (i32, i32, i32) {
    %c0_i32 = arith.constant 0 : i32
    %c0_i32_0 = arith.constant 0 : i32
    return %arg0, %c0_i32, %arg1 : i32, i32, i32
  }
  func.func @transform_1(%arg0: i32, %arg1: i32) -> (i32, i32) {
    %c0_i32 = arith.constant 0 : i32
    %c0_i32_0 = arith.constant 0 : i32
    %c0_i32_1 = arith.constant 0 : i32
    return %c0_i32, %c0_i32_0 : i32, i32
  }
  func.func @transform_2(%arg0: i32, %arg1: i32) -> (i32, i32) {
    %c0_i32 = arith.constant 0 : i32
    %c0_i32_0 = arith.constant 0 : i32
    %c0_i32_1 = arith.constant 0 : i32
    return %c0_i32, %c0_i32_0 : i32, i32
  }
  func.func @transform_3(%arg0: i32, %arg1: i32) -> (i32, i32) {
    %c0_i32 = arith.constant 0 : i32
    %c0_i32_0 = arith.constant 0 : i32
    %c0_i32_1 = arith.constant 0 : i32
    return %c0_i32, %c0_i32_0 : i32, i32
  }
  func.func @transform_4(%arg0: i32, %arg1: i32) -> (i32, i32) {
    %c0_i32 = arith.constant 0 : i32
    %c0_i32_0 = arith.constant 0 : i32
    %c0_i32_1 = arith.constant 0 : i32
    return %c0_i32, %c0_i32_0 : i32, i32
  }
  func.func @transform_5(%arg0: i32, %arg1: i32) -> (i32, i32) {
    %c0_i32 = arith.constant 0 : i32
    %c0_i32_0 = arith.constant 0 : i32
    %c0_i32_1 = arith.constant 0 : i32
    return %c0_i32, %c0_i32_0 : i32, i32
  }
  func.func @transform_6(%arg0: i32, %arg1: i32) -> (i32, i32) {
    %c0_i32 = arith.constant 0 : i32
    %c0_i32_0 = arith.constant 0 : i32
    %c0_i32_1 = arith.constant 0 : i32
    return %c0_i32, %c0_i32_0 : i32, i32
  }
  func.func @transform_7(%arg0: i32, %arg1: i32) -> (i32, i32) {
    %c0_i32 = arith.constant 0 : i32
    %c0_i32_0 = arith.constant 0 : i32
    %c0_i32_1 = arith.constant 0 : i32
    return %c0_i32, %c0_i32_0 : i32, i32
  }
  func.func @transform_8(%arg0: i32, %arg1: i32) -> (i32, i32, i32) {
    %c0_i32 = arith.constant 0 : i32
    %c0_i32_0 = arith.constant 0 : i32
    return %arg0, %c0_i32, %arg1 : i32, i32, i32
  }
  func.func @transform_9(%arg0: i32, %arg1: i32) -> (i32, i32, i32) {
    %c0_i32 = arith.constant 0 : i32
    %c0_i32_0 = arith.constant 0 : i32
    return %arg0, %c0_i32, %arg1 : i32, i32, i32
  }
  func.func @transform_10(%arg0: i32, %arg1: i32) -> (i32, i32, i32) {
    %c0_i32 = arith.constant 0 : i32
    %c0_i32_0 = arith.constant 0 : i32
    return %arg0, %c0_i32, %arg1 : i32, i32, i32
  }
  func.func @transform_11(%arg0: i32, %arg1: i32) -> (i32, i32, i32) {
    %c0_i32 = arith.constant 0 : i32
    %c0_i32_0 = arith.constant 0 : i32
    return %arg0, %arg1, %c0_i32 : i32, i32, i32
  }
}

</mosaic_0001>

<bundles_post_ra>
// kernel: vqvae_forward.1
= control target key start
LH: loop header
LB: loop body
LE: loop exit
PB: predicated region body
PF: predicated region fallthrough
CT: control target
= control target key end

     0   :  { %s1516_s17 = smov 0   ;;  %s1518_s18 = smov 0   ;;  %s1731_s0 = inlined_call_operand.vmem [shape: bf16[2,4,256], index: 0, kind: input, shape index: {}]   ;;  %s1732_s1 = inlined_call_operand.vmem [shape: bf16[32,4], index: 1, kind: input, shape index: {}]   ;;  %s1733_s2 = inlined_call_operand.vmem [shape: f32[32,1], index: 2, kind: input, shape index: {}]   ;;  %s1734_s3 = inlined_call_operand.vmem [shape: bf16[64,32], index: 3, kind: input, shape index: {}]   ;;  %s1735_s4 = inlined_call_operand.vmem [shape: bf16[32,64], index: 4, kind: input, shape index: {}]   ;;  %s1736_s5 = inlined_call_operand.vmem [shape: f32[64,1], index: 5, kind: input, shape index: {}]   ;;  %s1737_s6 = inlined_call_operand.vmem [shape: bf16[4,32], index: 6, kind: input, shape index: {}]   ;;  %s1738_s7 = inlined_call_operand.vmem [shape: f32[4,1], index: 7, kind: input, shape index: {}]   ;;  %s1739_s8 = inlined_call_operand.vmem [shape: f32[2,32,256], index: 8, kind: output, shape index: {0}]   ;;  %s1740_s9 = inlined_call_operand.vmem [shape: f32[2,4,256], index: 9, kind: output, shape index: {1}]   ;;  %s1741_s10 = inlined_call_operand.vmem [shape: s32[2,1,256], index: 10, kind: output, shape index: {2}]   ;;  %s1742_s11 = inlined_call_operand.vmem [shape: f32[2,16,128], index: 11, kind: output, shape index: {3}]  }
   0x1   :  { %s1520_s19 = smov 0   ;;  %s1522_s20 = smov 0  }
   0x2   :  { %s1524_s21 = smov 0   ;;  %s1526_s22 = smov 0  }
   0x3   :  { %s1528_s23 = smov 0  }
   0x4 LB: > { %1747 = sst [smem:[#allocation3_spill]] %s1442_s21  ;;  %s31_s24 = sadd.s32 1, %s1442_s21  ;;  %s1450_s23 = sphi %s1528_s23, %s22_s23   ;;  %s1446_s22 = sphi %s1526_s22, %s1757_s22   ;;  %s1442_s21 = sphi %s1524_s21, %s1756_s21   ;;  %s1438_s20 = sphi %s1522_s20, %s1760_s20   ;;  %s1434_s19 = sphi %s1520_s19, %s1754_s19   ;;  %s1430_s18 = sphi %s1518_s18, %s1759_s18   ;;  %s1426_s17 = sphi %s1516_s17, %s1758_s17  }
   0x5   : > { %1748 = sst [smem:[#allocation4_spill]] %s1446_s22  ;;  %p32_p0 = scmp.ge.s32.totalorder %s31_s24, 2 }
   0x6   : > { %s34_s25 = sadd.s32 1, %s1446_s22  ;;  %s1218_s26 = sadd.s32 4294967295, %s1450_s23  }
   0x7   : > { %p228_p1 = scmp.ne.s32.totalorder %s1430_s18, %s1426_s17  ;;  %s1762_s24 = smov (%p32_p0, %s31_s24), 0 }
   0x8   : > { %1749 = sst [smem:[#allocation5_spill]] %s1762_s24  ;;  %s1764_s25 = smov (!%p32_p0, %s34_s25), %s1446_s22 }
   0x9   : > { %s214_s27 = ssub.s32 %s1442_s21, %s1762_s24  ;;  %p229_p2 = scmp.eq.s32.totalorder %s1218_s26, 3 }
   0xa   : > { %p36_p3 = scmp.ge.s32.totalorder %s1764_s25, 2  ;;  %p1222_p4 = scmp.ge.s32.totalorder %s1450_s23, 1 }
   0xb   : > { %p1562_p5 = por %p229_p2, %p228_p1  ;;  %p369_p6 = scmp.lt.s32.totalorder %s1450_s23, 5 }
   0xc   : > { %s1766_s25 = smov (%p36_p3, %s1764_s25), 0  ;;  %s218_s12 = sadd.s32 1, %s1430_s18 }
   0xd   : > { %1751 = sst [smem:[#allocation6_spill]] %s1766_s25  ;;  %p370_p7 = pnand %p1222_p4, %p369_p6 }
   0xe   : > { %s213_s29 = ssub.s32 %s1446_s22, %s1766_s25  ;;  %p434_p9 = scmp.lt.s32.totalorder (!%p370_p7), %s1438_s20, 1  ;;  %v1388_v0 = vld [vmem:[%s1732_s1] sm:$0xff] (!%p370_p7)   ;;  %vm505_vm0 = vcmask (!%p370_p7), 31744   ;;  %v1452_v2 = vmov (!%p370_p7), 0   ;;  %v473_v3 = vld [vmem:[%s1733_s2 + $0x10] sm:$0xff] (!%p370_p7)  ;;  %v472_v4 = vld [vmem:[%s1733_s2 + $0x8] sm:$0xff] (!%p370_p7) }
   0xf   : > { %s215_s30 = sor.u32 %s214_s27, %s213_s29  ;;  %373 = sbr.rel (%p370_p7) target bundleno = 982 (0x3d6), region = 52  ;;  %1289 = vmatprep.mubr.msk.bf16.mxu0 (!%p370_p7), %vm505_vm0, %v1388_v0  ;;  %v471_v1 = vld [vmem:[%s1733_s2] sm:$0xff] (!%p370_p7)  ;;  %1386 = vset.pattern.permute.xlu0 (!%p370_p7), %v1452_v2  ;;  %v474_v5 = vld [vmem:[%s1733_s2 + $0x18] sm:$0xff] (!%p370_p7)  ;;  %vm512_vm1 = vcmask (!%p370_p7), 1041408   ;;  %v1389_v6 = vld [vmem:[%s1732_s1 + $0x8] sm:$0xff] (!%p370_p7)   ;;  %vm599_vm2 = vcmask (!%p370_p7), 261120  }
  0x10   : > { %p216_p8 = scmp.eq.s32.totalorder %s215_s30, 0  ;;  %p436_p10 = scmp.lt.s32.totalorder (!%p370_p7), %s1434_s19, 1  ;;  %1387 = vset.pattern.permute.xlu1 (!%p370_p7), %v1452_v2  ;;  %477 = vperm.xlu0 (!%p370_p7), %1386, %v471_v1   ;;  %v677_v7 = vld [vmem:[%s1736_s5] sm:$0xff] (!%p370_p7)  ;;  %v678_v10 = vld [vmem:[%s1736_s5 + $0x8] sm:$0xff] (!%p370_p7)  ;;  %v679_v11 = vld [vmem:[%s1736_s5 + $0x10] sm:$0xff] (!%p370_p7)  ;;  %vm837_vm3 = vcmask (!%p370_p7), 523264  }
  0x11   : > { %487 = vperm.xlu1 (!%p370_p7), %1387, %v473_v3   ;;  %v680_v12 = vld [vmem:[%s1736_s5 + $0x18] sm:$0xff] (!%p370_p7)  ;;  %v681_v13 = vld [vmem:[%s1736_s5 + $0x20] sm:$0xff] (!%p370_p7)  ;;  %v682_v14 = vld [vmem:[%s1736_s5 + $0x28] sm:$0xff] (!%p370_p7)  ;;  %s402_s27 = sand.u32 (!%p370_p7), 1, %s1426_s17  }
  0x12   : > { %s1573_s13 = scalar_select %p216_p8, %s1430_s18, %s218_s12  }
  0x13   : > { %v683_v15 = vld [vmem:[%s1736_s5 + $0x30] sm:$0xff] (!%p370_p7)  ;;  %v684_v16 = vld [vmem:[%s1736_s5 + $0x38] sm:$0xff] (!%p370_p7)  ;;  %v896_v17 = vld [vmem:[%s1738_s7] sm:$0xf] (!%p370_p7) }
  0x14   : > { %1752 = sst [smem:[#allocation7_spill]] %s1573_s13  ;;  %482 = vperm.xlu0 (!%p370_p7), %1386, %v472_v4   ;;  %v1390_v18 = vld [vmem:[%s1734_s3] sm:$0xff] (!%p370_p7)   ;;  %v1391_v33 = vld [vmem:[%s1734_s3 + $0x8] sm:$0xff] (!%p370_p7)   ;;  %v1392_v34 = vld [vmem:[%s1734_s3 + $0x10] sm:$0xff] (!%p370_p7)  }
  0x15   : > { %492 = vperm.xlu1 (!%p370_p7), %1387, %v474_v5   ;;  %1297 = vmatprep.mubr.msk.bf16.mxu1 (!%p370_p7), %vm599_vm2, %v1390_v18  ;;  %v1393_v35 = vld [vmem:[%s1734_s3 + $0x18] sm:$0xff] (!%p370_p7)   ;;  %v1394_v36 = vld [vmem:[%s1735_s4] sm:$0xff] (!%p370_p7)   ;;  %v733_v5 = vlaneseq (!%p370_p7) }
  0x16   : > { %s435_s16 = scalar_select %p434_p9, %s1438_s20, 1 }
  0x17   : > { %s437_s29 = scalar_select %p436_p10, %s1434_s19, 1 }
  0x18   : > { %s1224_s25 = sshll.u32 %s435_s16, 1  ;;  %687 = vperm.xlu0 %1386, %v677_v7  }
  0x19   : > { %s1589_s14 = sadd.s32 %s1224_s25, %s437_s29  ;;  %692 = vperm.xlu1 %1387, %v678_v10  }
  0x1a   : > { %s1225_s22 = sshll.u32 %s1589_s14, 1  ;;  %s1230_s12 = sshll.u32 %s1589_s14, 3 }
  0x1b   : > { %s441_s30 = scalar_lea.vmem %s1731_s0, %s1225_s22  ;;  %s464_s21 = scalar_lea.vmem %s1742_s11, %s1230_s12 }
  0x1c   : > { %v466_v8 = vld [vmem:[%s441_s30] sm:$0x3]  ;;  %697 = vperm.xlu0 %1386, %v679_v11   ;;  %s1223_s30 = sshll.u32 %s402_s27, 5  ;;  %s456_s27 = scalar_lea.vmem %s1741_s10, %s1589_s14 }
  0x1d   : > { %1325 = vmatprep.subr.msk.bf16.mxu0 %vm512_vm1, %v466_v8  ;;  %v514_v9 = vsel %vm512_vm1, %v466_v8, 0  ;;  %702 = vperm.xlu1 %1387, %v680_v12   ;;  %s1641_s16 = scalar_lea.vmem [#allocation2], %s1223_s30  ;;  %v734_v8 = vshrl.u32 %v733_v5, 7  ;;  %s1227_s22 = sshll.u32 %s1589_s14, 2 }
  0x1e   : > { %1288 = vmatpush3.bf16.msra.mxu0 %v514_v9  ;;  %s1265_s14 = sshll.u32 (%p1562_p5), %s1438_s20, 3 }
  0x1f   : > { %v735_v11 = vadd.s32 8, %v734_v8  ;;  %v736_v12 = vadd.s32 16, %v734_v8  ;;  %v741_v18 = vadd.s32 56, %v734_v8  ;;  %s989_s30 = sadd.s32 (%p1562_p5), %s1434_s19, %s1265_s14 }
  0x20   : > { %707 = vperm.xlu0 %1386, %v681_v13   ;;  %v737_v13 = vadd.s32 24, %v734_v8  ;;  %s1266_s17 = sshll.u32 (%p1562_p5), %s989_s30, 3 }
  0x21   : > { %1290 = vmatmul.mubr.msk.bf16.vlgmr.msra.gmra.mrb[0].mxu0 %vm505_vm0, %v1389_v6  ;;  %712 = vperm.xlu1 %1387, %v682_v14   ;;  %s991_s29 = scalar_lea.vmem (%p1562_p5), %s1739_s8, %s1266_s17 }
  0x22   : > { %1313 = vmatprep.mubr.msk.bf16.mxu0 %vm837_vm3, %v1394_v36 }
  0x24   : > { %717 = vperm.xlu0 %1386, %v683_v15   ;;  %v738_v15 = vadd.s32 32, %v734_v8 }
  0x25   : > { %722 = vperm.xlu1 %1387, %v684_v16   ;;  %v739_v16 = vadd.s32 40, %v734_v8 }
  0x28   : > { %899 = vperm.xlu0 %1386, %v896_v17   ;;  %v740_v17 = vadd.s32 48, %v734_v8 }
  0x8f   : > { %v478_v20 = vpop.permute.xlu0 %477 }
  0x90   : > { %v488_v19 = vpop.permute.xlu1 %487 }
  0x93   : > { %v483_v27 = vpop.permute.xlu0 %482 }
  0x94   : > { %v493_v24 = vpop.permute.xlu1 %492 }
  0x97   : > { %v688_v37 = vpop.permute.xlu0 %687 }
  0x98   : > { %v693_v38 = vpop.permute.xlu1 %692 }
  0x9b   : > { %v698_v39 = vpop.permute.xlu0 %697 }
  0x9c   : > { %v703_v40 = vpop.permute.xlu1 %702 }
  0x9f   : > { %v708_v43 = vpop.permute.xlu0 %707 }
  0xa0   : > { %v713_v46 = vpop.permute.xlu1 %712 }
  0xa3   : > { %v718_v47 = vpop.permute.xlu0 %717 }
  0xa4   : > { %v723_v52 = vpop.permute.xlu1 %722 }
  0xf4   : > { %v1291_v21 = vpop.f32.mrb[0].mxu0 }
  0xf5   : > { %v1637_v22 = vadd.f32 %v1291_v21, %v488_v19  ;;  %v550_v23 = vpop.f32.mrb[1].mxu0 }
  0xf6   : > { %v1639_v25 = vadd.f32 %v550_v23, %v478_v20  ;;  %v1292_v26 = vpop.f32.mrb[2].mxu0 }
  0xf7   : > { %567 = vst [vmem:[%s1641_s16 + $0x10] sm:$0xff] %v1637_v22  ;;  %v1645_v28 = vadd.f32 %v1292_v26, %v493_v24  ;;  %v553_v29 = vpop.f32.mrb[3].mxu0 }
  0xf8   : > { %565 = vst [vmem:[%s1641_s16] sm:$0xff] %v1639_v25  ;;  %v1649_v30 = vadd.f32 %v553_v29, %v483_v27 }
  0xf9   : > { %568 = vst [vmem:[%s1641_s16 + $0x18] sm:$0xff] %v1645_v28  ;;  %v570_v32 = vpack.c.bf16 %v1645_v28, %v1637_v22 }
  0xfa   : > { %566 = vst [vmem:[%s1641_s16 + $0x8] sm:$0xff] %v1649_v30  ;;  %v569_v31 = vpack.c.bf16 %v1649_v30, %v1639_v25 }
  0xfc   : > { %1293 = vmatprep.subr.bf16.mxu1 %v569_v31 }
  0xfd   : > { %1294 = vmatpush3.bf16.msra.mxu1 %v569_v31 }
  0xfe   : > { %1295 = vmatprep.subr.bf16.mxu1 %v570_v32  ;;  %v1029_v5 = vld [vmem:[%s1641_s16 + $0x10] sm:$0xff] (%p1562_p5) }
  0xff   : > { %1030 = vst [vmem:[%s991_s29 + $0x20] sm:$0xff] (%p1562_p5), %v1029_v5 }
 0x101   : > { %1296 = vmatpush3.bf16.msra.mxu1 %v570_v32 }
 0x104   : > { %1298 = vmatmul.mubr.msk.bf16.vlgmr.msra.gmra.mrb[0].mxu1 %vm599_vm2, %v1391_v33 }
 0x105   : > { %1301 = vmatprep.mubr.msk.bf16.mxu1 %vm599_vm2, %v1392_v34 }
 0x10c   : > { %1302 = vmatmul.mubr.msk.bf16.gmra.mrb[4].mxu1 %vm599_vm2, %v1393_v35 }
 0x1d7   : > { %v1299_v41 = vpop.f32.mrb[0].mxu1 }
 0x1d8   : > { %v646_v42 = vpop.f32.mrb[1].mxu1  ;;  %v727_v49 = vsub.f32 %v698_v39, %v1299_v41 }
 0x1d9   : > { %v1300_v44 = vpop.f32.mrb[2].mxu1  ;;  %v725_v53 = vsub.f32 %v688_v37, %v646_v42 }
 0x1da   : > { %v649_v45 = vpop.f32.mrb[3].mxu1  ;;  %v728_v56 = vsub.f32 %v703_v40, %v1300_v44  ;;  %v1453_v44 = vmov 1.0|1.0  }
 0x1db   : > { %v726_v60 = vsub.f32 %v693_v38, %v649_v45  ;;  %v1395_v45 = vld [vmem:[%s1735_s4 + $0x8] sm:$0xff]  }
 0x1df   : > { %v1303_v48 = vpop.f32.mrb[4].mxu1 }
 0x1e0   : > { %v731_v50 = vsub.f32 %v718_v47, %v1303_v48  ;;  %v662_v51 = vpop.f32.mrb[5].mxu1 }
 0x1e1   : > { %v729_v54 = vsub.f32 %v708_v43, %v662_v51  ;;  %v1304_v55 = vpop.f32.mrb[6].mxu1 }
 0x1e2   : > { %v744_v57 = vmin.f32 %v727_v49, %v731_v50  ;;  %v732_v58 = vsub.f32 %v723_v52, %v1304_v55  ;;  %v665_v59 = vpop.f32.mrb[7].mxu1 }
 0x1e3   : > { %v742_v61 = vmin.f32 %v725_v53, %v729_v54  ;;  %v730_v62 = vsub.f32 %v713_v46, %v665_v59  ;;  %v1454_v46 = vmov 0.0  }
 0x1e4   : > { %v745_v63 = vmin.f32 %v728_v56, %v732_v58  ;;  %1317 = vmatprep.subr.bf16.mxu1 %v1454_v46 }
 0x1e5   : > { %v743_v0 = vmin.f32 %v726_v60, %v730_v62 }
 0x1e6   : > { %v747_v1 = vmin.f32 %v744_v57, %v745_v63 }
 0x1e7   : > { %v746_v2 = vmin.f32 %v742_v61, %v743_v0 }
 0x1e9   : > { %v748_v3 = vmin.f32 %v746_v2, %v747_v1 }
 0x1eb   : > { %v749_v4 = vrot.slane %v748_v3, 4 }
 0x1ed   : > { %v750_v6 = vmin.f32 %v748_v3, %v749_v4  ;;  %v1025_v3 = vld [vmem:[%s1641_s16] sm:$0xff] (%p1562_p5)  ;;  %v1027_v4 = vld [vmem:[%s1641_s16 + $0x8] sm:$0xff] (%p1562_p5) }
 0x1ee   : > { %1026 = vst [vmem:[%s991_s29] sm:$0xff] (%p1562_p5), %v1025_v3  ;;  %1028 = vst [vmem:[%s991_s29 + $0x10] sm:$0xff] (%p1562_p5), %v1027_v4 }
 0x1ef   : > { %v751_v7 = vrot.slane %v750_v6, 2 }
 0x1f1   : > { %v752_v9 = vmin.f32 %v750_v6, %v751_v7  ;;  %v1031_v6 = vld [vmem:[%s1641_s16 + $0x18] sm:$0xff] (%p1562_p5) }
 0x1f2   : > { %1032 = vst [vmem:[%s991_s29 + $0x30] sm:$0xff] (%p1562_p5), %v1031_v6 }
 0x1f3   : > { %v753_v10 = vrot.slane %v752_v9, 1 }
 0x1f5   : > { %v754_v14 = vmin.f32 %v752_v9, %v753_v10 }
 0x1f7   : > { %vm755_vm4 = vcmp.le.f32.partialorder %v725_v53, %v754_v14  ;;  %vm756_vm5 = vcmp.le.f32.partialorder %v726_v60, %v754_v14  ;;  %vm757_vm6 = vcmp.le.f32.partialorder %v727_v49, %v754_v14  ;;  %vm758_vm7 = vcmp.le.f32.partialorder %v728_v56, %v754_v14 }
 0x1f8   : > { %vm759_vm8 = vcmp.le.f32.partialorder %v729_v54, %v754_v14  ;;  %vm760_vm9 = vcmp.le.f32.partialorder %v730_v62, %v754_v14  ;;  %vm761_vm10 = vcmp.le.f32.partialorder %v731_v50, %v754_v14  ;;  %vm762_vm11 = vcmp.le.f32.partialorder %v732_v58, %v754_v14 }
 0x1f9   : > { %v763_v19 = vsel %vm755_vm4, %v734_v8, 64  ;;  %v764_v20 = vsel %vm756_vm5, %v735_v11, 64  ;;  %v765_v21 = vsel %vm757_vm6, %v736_v12, 64  ;;  %v766_v23 = vsel %vm758_vm7, %v737_v13, 64 }
 0x1fa   : > { %v767_v24 = vsel %vm759_vm8, %v738_v15, 64  ;;  %v768_v26 = vsel %vm760_vm9, %v739_v16, 64  ;;  %v769_v27 = vsel %vm761_vm10, %v740_v17, 64  ;;  %v770_v29 = vsel %vm762_vm11, %v741_v18, 64 }
 0x1fb   : > { %vm771_vm12 = vcmp.lt.s32.totalorder %v763_v19, %v767_v24  ;;  %vm773_vm13 = vcmp.lt.s32.totalorder %v764_v20, %v768_v26  ;;  %vm775_vm14 = vcmp.lt.s32.totalorder %v765_v21, %v769_v27  ;;  %vm777_vm15 = vcmp.lt.s32.totalorder %v766_v23, %v770_v29 }
 0x1fc   : > { %v772_v31 = vsel %vm771_vm12, %v763_v19, %v767_v24  ;;  %v774_v32 = vsel %vm773_vm13, %v764_v20, %v768_v26  ;;  %v776_v33 = vsel %vm775_vm14, %v765_v21, %v769_v27  ;;  %v778_v34 = vsel %vm777_vm15, %v766_v23, %v770_v29 }
 0x1fd   : > { %vm779_vm0 = vcmp.lt.s32.totalorder %v772_v31, %v774_v32  ;;  %vm781_vm1 = vcmp.lt.s32.totalorder %v776_v33, %v778_v34 }
 0x1fe   : > { %v780_v35 = vsel %vm779_vm0, %v772_v31, %v774_v32  ;;  %v782_v36 = vsel %vm781_vm1, %v776_v33, %v778_v34 }
 0x1ff   : > { %vm783_vm4 = vcmp.lt.s32.totalorder %v780_v35, %v782_v36 }
 0x200   : > { %v784_v37 = vsel %vm783_vm4, %v780_v35, %v782_v36 }
 0x201   : > { %v785_v38 = vrot.slane %v784_v37, 4 }
 0x203   : > { %vm786_vm5 = vcmp.lt.s32.totalorder %v784_v37, %v785_v38 }
 0x204   : > { %v787_v39 = vsel %vm786_vm5, %v784_v37, %v785_v38 }
 0x205   : > { %v788_v40 = vrot.slane %v787_v39, 2 }
 0x207   : > { %vm789_vm6 = vcmp.lt.s32.totalorder %v787_v39, %v788_v40 }
 0x208   : > { %v790_v41 = vsel %vm789_vm6, %v787_v39, %v788_v40  ;;  %vm1455_vm6 = vmmov 0  }
 0x209   : > { %v791_v42 = vrot.slane %v790_v41, 1  ;;  %1321 = vmatprep.mubr.msk.bf16.mxu1 %vm1455_vm6, %v1454_v46 }
 0x20b   : > { %vm792_vm7 = vcmp.lt.s32.totalorder %v790_v41, %v791_v42 }
 0x20c   : > { %v793_v43 = vsel %vm792_vm7, %v790_v41, %v791_v42 }
 0x20d   : > { %794 = vst [vmem:[%s456_s27] sm:$0x1] %v793_v43  ;;  %vm795_vm8 = vcmp.eq.s32.totalorder %v734_v8, %v793_v43  ;;  %vm796_vm9 = vcmp.eq.s32.totalorder %v735_v11, %v793_v43  ;;  %vm797_vm10 = vcmp.eq.s32.totalorder %v736_v12, %v793_v43  ;;  %vm798_vm11 = vcmp.eq.s32.totalorder %v737_v13, %v793_v43  ;;  %s449_s27 = scalar_lea.vmem %s1740_s9, %s1227_s22 }
 0x20e   : > { %vm1253_vm12 = vmpackc.low %vm796_vm9, %vm795_vm8  ;;  %vm799_vm14 = vcmp.eq.s32.totalorder %v738_v15, %v793_v43  ;;  %vm800_vm15 = vcmp.eq.s32.totalorder %v739_v16, %v793_v43  ;;  %vm801_vm1 = vcmp.eq.s32.totalorder %v740_v17, %v793_v43  ;;  %vm802_vm4 = vcmp.eq.s32.totalorder %v741_v18, %v793_v43 }
 0x20f   : > { %1305 = vmatprep.subr.msk.bf16.mxu0 %vm1253_vm12, %v1453_v44  ;;  %vm1255_vm13 = vmpackc.low %vm798_vm11, %vm797_vm10 }
 0x210   : > { %1306 = vmatpush3.bf16.msk.msra.mxu0 %vm1253_vm12, %v1453_v44  ;;  %vm1257_vm0 = vmpackc.low %vm800_vm15, %vm799_vm14 }
 0x211   : > { %1307 = vmatprep.subr.msk.bf16.mxu0 %vm1255_vm13, %v1453_v44  ;;  %vm1259_vm5 = vmpackc.low %vm802_vm4, %vm801_vm1 }
 0x214   : > { %1308 = vmatpush3.bf16.msk.msra.mxu0 %vm1255_vm13, %v1453_v44 }
 0x215   : > { %1309 = vmatprep.subr.msk.bf16.mxu0 %vm1257_vm0, %v1453_v44 }
 0x218   : > { %1310 = vmatpush3.bf16.msk.msra.mxu0 %vm1257_vm0, %v1453_v44 }
 0x219   : > { %1311 = vmatprep.subr.msk.bf16.mxu0 %vm1259_vm5, %v1453_v44 }
 0x21c   : > { %1312 = vmatpush3.bf16.msk.msra.mxu0 %vm1259_vm5, %v1453_v44 }
 0x21f   : > { %1314 = vmatmul.mubr.msk.bf16.vlgmr.msra.gmra.mrb[4].mxu0 %vm837_vm3, %v1395_v45 }
 0x2f2   : > { %v1315_v47 = vpop.f32.mrb[4].mxu0 }
 0x2f3   : > { %v878_v48 = vpop.f32.mrb[5].mxu0  ;;  %v948_v53 = vsub.f32 %v1315_v47, %v1637_v22  ;;  %v893_v22 = vld [vmem:[%s1737_s6] sm:$0x3] }
 0x2f4   : > { %v946_v49 = vsub.f32 %v878_v48, %v1639_v25  ;;  %v1316_v50 = vpop.f32.mrb[6].mxu0 }
 0x2f5   : > { %v895_v51 = vpack.c.bf16 %v1316_v50, %v1315_v47  ;;  %v881_v52 = vpop.f32.mrb[7].mxu0  ;;  %v949_v57 = vsub.f32 %v1316_v50, %v1645_v28  ;;  %v952_v59 = vmul.f32 %v948_v53, %v948_v53  ;;  %v900_v28 = vpop.permute.xlu0 %899 }
 0x2f6   : > { %v894_v54 = vpack.c.bf16 %v881_v52, %v878_v48  ;;  %v947_v55 = vsub.f32 %v881_v52, %v1649_v30  ;;  %v950_v56 = vmul.f32 %v946_v49, %v946_v49 }
 0x2f7   : > { %v953_v61 = vmul.f32 %v949_v57, %v949_v57 }
 0x2f8   : > { %v951_v58 = vmul.f32 %v947_v55, %v947_v55  ;;  %1318 = vmatpush3.bf16.msra.mxu1 %v894_v54 }
 0x2f9   : > { %1319 = vmatprep.subr.bf16.mxu1 %v1454_v46 }
 0x2fa   : > { %v954_v60 = vadd.f32 %v951_v58, %v950_v56 }
 0x2fc   : > { %v955_v25 = vadd.f32 %v954_v60, %v952_v59  ;;  %1320 = vmatpush3.bf16.msra.mxu1 %v895_v51 }
 0x2fe   : > { %v956_v30 = vadd.f32 %v955_v25, %v953_v61 }
 0x2ff   : > { %1322 = vmatmul.mubr.msk.bf16.vlgmr.msra.gmra.mrb[8].mxu1 %vm599_vm2, %v893_v22 }
 0x300   : > { %957 = vst [vmem:[%s464_s21] sm:$0xff] %v956_v30 }
 0x3cf   : > { %987 = sbr.rel (!%p1562_p5) target bundleno = 982 (0x3d6), region = 56 }
 0x3d2   : > { %v939_v62 = vpop.f32.mrb[8].mxu1 }
 0x3d3   : > { %v940_v63 = vadd.f32 %v939_v62, %v900_v28  ;;  %v1323_v0 = vpop.f32.mrb[9].mxu1 }
 0x3d4   : > { %v942_v1 = vpop.f32.mrb[10].mxu1 }
 0x3d5   : > { %945 = vst [vmem:[%s449_s27] sm:$0xf] %v940_v63  ;;  %v1324_v2 = vpop.f32.mrb[11].mxu1 }
 0x3d6 PF: > { %s22_s23 = sadd.s32 1, %s1450_s23   ;;  %s1753_s20 = sld [smem:[#allocation7_spill]] }
 0x3d7   : > { %p19_p11 = scmp.ge.s32.totalorder %s22_s23, 6   ;;  %s1754_s19 = sld [smem:[#allocation3_spill]] }
 0x3d8   : > { %s1755_s28 = sld [smem:[#allocation4_spill]]  ;;  %s1756_s21 = sld [smem:[#allocation5_spill]] }
 0x3d9   : > { %s1757_s22 = sld [smem:[#allocation6_spill]]  ;;  %s1758_s17 = smov %s1430_s18 }
 0x3da   :  { %21 = sbr.rel (!%p19_p11) target bundleno = 4 (0x4), region = 156 }
 0x3dc   : > { %s1759_s18 = smov %s1753_s20 }
 0x3de   : > { %s1760_s20 = smov %s1755_s28 }

</bundles_post_ra>
